<compile_context>
chip_gen: v6e
topology: v6e:2x2x1
jax: 0.10.0
libtpu: 0.0.40
codegen_flags: <defaults>
</compile_context>

<pallas_src>
import functools

import jax
import jax.numpy as jnp
from jax.experimental import pallas as pl
from jax.experimental.pallas import tpu as pltpu

LN_EPS = 1e-5  # PyTorch nn.LayerNorm default


# ----------------------------------------------------------------------------- utils
def _pick_row_tile(m, row_bytes, fixed_bytes=0):
    """Row-tile picker: large, 128-aligned tiles when possible; keeps the working
    set under ~40 MiB (safe for v7x's 64 MiB/TC VMEM); prefers >= 2 grid steps so
    the "parallel" grid axis can be sharded across both v7x TensorCores."""
    budget = (40 << 20) - fixed_bytes
    cap = max(8, budget // max(row_bytes, 1))
    for t in (512, 256, 128):
        if t <= cap and m >= 2 * t:
            return t
    if m <= min(cap, 512):
        return m  # single full-extent block for small inputs (grid = 1)
    return max(8, (min(128, cap) // 8) * 8)


def _const_spec(shape):
    """BlockSpec for operands fetched once (constant index_map).  Single-buffered
    (pl.Buffered(1)) when supported — double-buffering a never-changing block is
    pure VMEM waste."""
    ndim = len(shape)
    idx = lambda i: (0,) * ndim
    try:
        return pl.BlockSpec(shape, idx, pipeline_mode=pl.Buffered(buffer_count=1))
    except Exception:  # older Pallas without pipeline_mode / Buffered
        return pl.BlockSpec(shape, idx)


def _compiler_params(vmem_est_bytes):
    return pltpu.CompilerParams(
        dimension_semantics=("parallel",),
        vmem_limit_bytes=int(min(max(vmem_est_bytes * 2, 16 << 20), 64 << 20)),
    )


def _block_diag(w):
    # [nb, bs, bs] block weights -> dense block-diagonal [nb*bs, nb*bs] so that
    # einsum('...bd,bdk->...bk', x, w) == x_flat @ dense.  Used only for small bs.
    nb, bs, _ = w.shape
    eye = jnp.eye(nb, dtype=w.dtype)
    return jnp.einsum("bdk,bc->bdck", w, eye).reshape(nb * bs, nb * bs)


def _softshrink(v, lam):
    return jnp.sign(v) * jnp.maximum(jnp.abs(v) - lam, 0.0)


# ----------------------------------------------------------------------------- kernels
def _layernorm_kernel(x_ref, g_ref, b_ref, o_ref):
    x = x_ref[...].astype(jnp.float32)
    mu = jnp.mean(x, axis=-1, keepdims=True)
    xc = x - mu
    var = jnp.mean(xc * xc, axis=-1, keepdims=True)
    y = xc * jax.lax.rsqrt(var + LN_EPS)
    o_ref[...] = (y * g_ref[...] + b_ref[...]).astype(o_ref.dtype)


def _afno_spectral_dense_kernel(re_ref, im_ref, w1r_ref, w1i_ref, w2r_ref, w2i_ref,
                                b1r_ref, b1i_ref, b2r_ref, b2i_ref,
                                or_ref, oi_ref, *, softshrink):
    # bf16 MXU operands, f32 accumulation.
    dot = lambda a, b: jnp.dot(a, b, preferred_element_type=jnp.float32)
    re = re_ref[...]
    im = im_ref[...]
    w1r, w1i = w1r_ref[...], w1i_ref[...]
    w2r, w2i = w2r_ref[...], w2i_ref[...]
    r1 = jnp.maximum(dot(re, w1r) - dot(im, w1i) + b1r_ref[...], 0.0)
    i1 = jnp.maximum(dot(re, w1i) + dot(im, w1r) + b1i_ref[...], 0.0)
    r1b = r1.astype(jnp.bfloat16)
    i1b = i1.astype(jnp.bfloat16)
    r2 = dot(r1b, w2r) - dot(i1b, w2i) + b2r_ref[...]
    # Reference quirk: the second x_imag uses the *updated* x_real (r2), not r1.
    i2 = dot(r2.astype(jnp.bfloat16), w2i) + dot(i1b, w2r) + b2i_ref[...]
    if softshrink:
        r2 = _softshrink(r2, softshrink)
        i2 = _softshrink(i2, softshrink)
    or_ref[...] = r2.astype(or_ref.dtype)
    oi_ref[...] = i2.astype(oi_ref.dtype)


def _afno_spectral_block_kernel(re_ref, im_ref, w1r_ref, w1i_ref, w2r_ref, w2i_ref,
                                b1r_ref, b1i_ref, b2r_ref, b2i_ref,
                                or_ref, oi_ref, *, softshrink, num_blocks, block_size):
    # Per-block contraction (used when block_size % 128 == 0): avoids densifying the
    # block-diagonal weights, i.e. num_blocks x fewer FLOPs and weight bytes.
    dot = lambda a, b: jnp.dot(a, b, preferred_element_type=jnp.float32)
    for b in range(num_blocks):
        lo, hi = b * block_size, (b + 1) * block_size
        re = re_ref[:, lo:hi]
        im = im_ref[:, lo:hi]
        w1r, w1i = w1r_ref[b], w1i_ref[b]
        w2r, w2i = w2r_ref[b], w2i_ref[b]
        r1 = jnp.maximum(dot(re, w1r) - dot(im, w1i) + b1r_ref[:, lo:hi], 0.0)
        i1 = jnp.maximum(dot(re, w1i) + dot(im, w1r) + b1i_ref[:, lo:hi], 0.0)
        r1b = r1.astype(jnp.bfloat16)
        i1b = i1.astype(jnp.bfloat16)
        r2 = dot(r1b, w2r) - dot(i1b, w2i) + b2r_ref[:, lo:hi]
        i2 = dot(r2.astype(jnp.bfloat16), w2i) + dot(i1b, w2r) + b2i_ref[:, lo:hi]
        if softshrink:
            r2 = _softshrink(r2, softshrink)
            i2 = _softshrink(i2, softshrink)
        or_ref[:, lo:hi] = r2.astype(or_ref.dtype)
        oi_ref[:, lo:hi] = i2.astype(oi_ref.dtype)


def _residual_mlp_kernel(x_ref, f_ref, g_ref, b_ref, w1_ref, b1_ref, o_ref, *, ratio):
    # x1 = x + filter_out ; out = x1 + pool(gelu(LN2(x1) @ W1 + b1))
    x1 = x_ref[...].astype(jnp.float32) + f_ref[...].astype(jnp.float32)
    mu = jnp.mean(x1, axis=-1, keepdims=True)
    xc = x1 - mu
    var = jnp.mean(xc * xc, axis=-1, keepdims=True)
    y = xc * jax.lax.rsqrt(var + LN_EPS) * g_ref[...] + b_ref[...]
    h = jnp.dot(y.astype(jnp.bfloat16), w1_ref[...],
                preferred_element_type=jnp.float32) + b1_ref[...]
    # TODO(synk): PyTorch nn.GELU() default is erf-exact; tanh approximation is used
    # here for guaranteed Mosaic (EUP tanh) lowering.
    h = jax.nn.gelu(h, approximate=True)
    # AdaptiveAvgPool1d as VPU adds: fc1 columns were permuted at trace time into a
    # [ratio, C] layout, so pooled channel c = mean_r h[:, r*C + c].  No pool matmul.
    c = o_ref.shape[-1]
    pooled = h[:, 0:c]
    for r in range(1, ratio):
        pooled = pooled + h[:, r * c:(r + 1) * c]
    pooled = pooled * (1.0 / ratio)
    o_ref[...] = (x1 + pooled).astype(o_ref.dtype)


# ----------------------------------------------------------------------------- wrappers
def layernorm_pallas(x2d, gamma, beta):
    m, c = x2d.shape
    isz = x2d.dtype.itemsize
    row_bytes = (2 * 2 * isz + 3 * 4) * c           # in/out double-buffered + f32 temps
    fixed = 2 * 2 * c * 4                           # gamma/beta
    tm = _pick_row_tile(m, row_bytes, fixed)
    est = tm * row_bytes + fixed
    return pl.pallas_call(
        _layernorm_kernel,
        out_shape=jax.ShapeDtypeStruct((m, c), x2d.dtype),
        grid_spec=pltpu.PrefetchScalarGridSpec(
            num_scalar_prefetch=0,
            grid=(pl.cdiv(m, tm),),
            in_specs=[pl.BlockSpec((tm, c), lambda i: (i, 0)),
                      _const_spec((1, c)),
                      _const_spec((1, c))],
            out_specs=pl.BlockSpec((tm, c), lambda i: (i, 0)),
        ),
        compiler_params=_compiler_params(est),
    )(x2d, gamma.reshape(1, c), beta.reshape(1, c))


def spectral_mix_pallas(re, im, w1r, w1i, w2r, w2i, b1r, b1i, b2r, b2i,
                        softshrink, num_blocks):
    m, c = re.shape
    per_block = (w1r.ndim == 3)
    isz = re.dtype.itemsize
    row_bytes = (2 * 2 * isz + 2 * 2 * 4 + 6 * 4) * c   # bf16 in x2, f32 out x2, temps
    w_bytes = sum(a.size * a.dtype.itemsize for a in (w1r, w1i, w2r, w2i))
    fixed = 2 * w_bytes + 2 * 4 * c * 4                 # conservative (double-buffered)
    tm = _pick_row_tile(m, row_bytes, fixed)
    est = tm * row_bytes + fixed

    if per_block:
        bs = w1r.shape[-1]
        kern = functools.partial(_afno_spectral_block_kernel, softshrink=softshrink,
                                 num_blocks=num_blocks, block_size=bs)
        w_spec = _const_spec(w1r.shape)
    else:
        kern = functools.partial(_afno_spectral_dense_kernel, softshrink=softshrink)
        w_spec = _const_spec((c, c))
    b_spec = _const_spec((1, c))
    row_spec = pl.BlockSpec((tm, c), lambda i: (i, 0))

    out_r, out_i = pl.pallas_call(
        kern,
        out_shape=(jax.ShapeDtypeStruct((m, c), jnp.float32),
                   jax.ShapeDtypeStruct((m, c), jnp.float32)),
        grid_spec=pltpu.PrefetchScalarGridSpec(
            num_scalar_prefetch=0,
            grid=(pl.cdiv(m, tm),),
            in_specs=[row_spec, row_spec, w_spec, w_spec, w_spec, w_spec,
                      b_spec, b_spec, b_spec, b_spec],
            out_specs=(pl.BlockSpec((tm, c), lambda i: (i, 0)),
                       pl.BlockSpec((tm, c), lambda i: (i, 0))),
        ),
        compiler_params=_compiler_params(est),
    )(re, im, w1r, w1i, w2r, w2i,
      b1r.reshape(1, c), b1i.reshape(1, c), b2r.reshape(1, c), b2i.reshape(1, c))
    return out_r, out_i


def residual_mlp_pallas(x2d, filt2d, gamma, beta, w1, b1, ratio):
    m, c = x2d.shape
    hdim = w1.shape[1]
    isz = x2d.dtype.itemsize
    row_bytes = 6 * isz * c + 14 * c + 5 * hdim         # x/f/out x2 buffers + temps + h
    fixed = 2 * (w1.size * w1.dtype.itemsize + hdim * 4) + 2 * 2 * c * 4
    tm = _pick_row_tile(m, row_bytes, fixed)
    est = tm * row_bytes + fixed
    return pl.pallas_call(
        functools.partial(_residual_mlp_kernel, ratio=ratio),
        out_shape=jax.ShapeDtypeStruct((m, c), x2d.dtype),
        grid_spec=pltpu.PrefetchScalarGridSpec(
            num_scalar_prefetch=0,
            grid=(pl.cdiv(m, tm),),
            in_specs=[pl.BlockSpec((tm, c), lambda i: (i, 0)),
                      pl.BlockSpec((tm, c), lambda i: (i, 0)),
                      _const_spec((1, c)),
                      _const_spec((1, c)),
                      _const_spec((c, hdim)),
                      _const_spec((1, hdim))],
            out_specs=pl.BlockSpec((tm, c), lambda i: (i, 0)),
        ),
        compiler_params=_compiler_params(est),
    )(x2d, filt2d, gamma.reshape(1, c), beta.reshape(1, c), w1, b1.reshape(1, hdim))


# ----------------------------------------------------------------------------- forward
def afno_block_forward(x, params, *, h, w, num_blocks, softshrink=0.0):
    """x: [B, N, C] with N == h*w.  Returns [B, N, C].  drop/drop_path = 0, fno_bias=False."""
    B, N, C = x.shape
    assert N == h * w
    bs = C // num_blocks
    x2d = x.reshape(B * N, C)

    # ---- branch 1: x + filter(LN1(x)) ----
    y1 = layernorm_pallas(x2d, params["ln1_g"], params["ln1_b"])

    # rfft2 / irfft2 have no Pallas equivalent -> jnp.fft (XLA FFT) glue.
    xf = jnp.fft.rfft2(y1.reshape(B, h, w, C).astype(jnp.float32),
                       axes=(1, 2), norm="ortho")
    wf = w // 2 + 1
    re = jnp.real(xf).reshape(B * h * wf, C).astype(jnp.bfloat16)
    im = jnp.imag(xf).reshape(B * h * wf, C).astype(jnp.bfloat16)

    # Keep block structure when bs is MXU/lane friendly; densify only for small bs.
    if bs % 128 == 0:
        w1r = params["w1"][0].astype(jnp.bfloat16)
        w1i = params["w1"][1].astype(jnp.bfloat16)
        w2r = params["w2"][0].astype(jnp.bfloat16)
        w2i = params["w2"][1].astype(jnp.bfloat16)
    else:
        w1r = _block_diag(params["w1"][0]).astype(jnp.bfloat16)
        w1i = _block_diag(params["w1"][1]).astype(jnp.bfloat16)
        w2r = _block_diag(params["w2"][0]).astype(jnp.bfloat16)
        w2i = _block_diag(params["w2"][1]).astype(jnp.bfloat16)
    b1r = params["b1"][0].reshape(-1).astype(jnp.float32)
    b1i = params["b1"][1].reshape(-1).astype(jnp.float32)
    b2r = params["b2"][0].reshape(-1).astype(jnp.float32)
    b2i = params["b2"][1].reshape(-1).astype(jnp.float32)

    r2, i2 = spectral_mix_pallas(re, im, w1r, w1i, w2r, w2i, b1r, b1i, b2r, b2i,
                                 softshrink, num_blocks)
    xo = (r2 + 1j * i2).reshape(B, h, wf, C)
    filt = jnp.fft.irfft2(xo, s=(h, w), axes=(1, 2), norm="ortho")
    filt2d = filt.reshape(B * N, C).astype(x.dtype)
    # TODO(synk): fno_bias=True (per-token Conv1d bias) not implemented; this models
    # the fno_bias=False constructor branch (bias == zeros).

    # ---- branch 2 (fused): x1 = x + filt; out = x1 + pool(gelu(LN2(x1) @ W1 + b1)) ----
    hidden = params["fc1_w"].shape[1]
    assert hidden % C == 0
    ratio = hidden // C
    # Permute fc1 columns (and bias) to a [ratio, C] hidden layout so AdaptiveAvgPool1d
    # becomes plain adds inside the kernel (no pool matmul, no pool operand).
    perm = jnp.arange(hidden).reshape(C, ratio).T.reshape(-1)
    fc1_w = params["fc1_w"][:, perm].astype(jnp.bfloat16)
    fc1_b = params["fc1_b"][perm].astype(jnp.float32)

    out2d = residual_mlp_pallas(x2d, filt2d, params["ln2_g"], params["ln2_b"],
                                fc1_w, fc1_b, ratio)
    return out2d.reshape(B, N, C)


# ----------------------------------------------------------------------------- reference
def afno_block_reference(x, params, *, h, w, num_blocks, softshrink=0.0):
    B, N, C = x.shape
    bs = C // num_blocks

    def ln(v, g, b):
        mu = v.mean(-1, keepdims=True)
        var = ((v - mu) ** 2).mean(-1, keepdims=True)
        return (v - mu) / jnp.sqrt(var + LN_EPS) * g + b

    y = ln(x, params["ln1_g"], params["ln1_b"])
    xf = jnp.fft.rfft2(y.reshape(B, h, w, C), axes=(1, 2), norm="ortho")
    wf = w // 2 + 1
    xr = jnp.real(xf).reshape(B, h, wf, num_blocks, bs)
    xi = jnp.imag(xf).reshape(B, h, wf, num_blocks, bs)
    mult = lambda a, wt: jnp.einsum("...bd,bdk->...bk", a, wt)
    w1, b1, w2, b2 = params["w1"], params["b1"], params["w2"], params["b2"]
    r1 = jax.nn.relu(mult(xr, w1[0]) - mult(xi, w1[1]) + b1[0])
    i1 = jax.nn.relu(mult(xr, w1[1]) + mult(xi, w1[0]) + b1[1])
    r2 = mult(r1, w2[0]) - mult(i1, w2[1]) + b2[0]
    i2 = mult(r2, w2[1]) + mult(i1, w2[0]) + b2[1]
    if softshrink:
        r2 = jnp.sign(r2) * jnp.maximum(jnp.abs(r2) - softshrink, 0.0)
        i2 = jnp.sign(i2) * jnp.maximum(jnp.abs(i2) - softshrink, 0.0)
    xo = (r2 + 1j * i2).reshape(B, h, wf, C)
    filt = jnp.fft.irfft2(xo, s=(h, w), axes=(1, 2), norm="ortho").reshape(B, N, C)
    x1 = x + filt
    y2 = ln(x1, params["ln2_g"], params["ln2_b"])
    hid = jax.nn.gelu(y2 @ params["fc1_w"] + params["fc1_b"], approximate=True)
    ratio = hid.shape[-1] // C
    pooled = hid.reshape(B, N, C, ratio).mean(-1)
    return x1 + pooled


if __name__ == "__main__":
    # Small shapes consistent with the module: dim=32, h=w=8 (N=64), 4 FNO blocks,
    # mlp_ratio=4, fno_bias=False, fno_softshrink=0.0, drop=drop_path=0, batch=2.
    B, dim, h, w = 2, 32, 8, 8
    num_blocks, mlp_ratio = 4, 4
    softshrink = 0.0
    N = h * w
    bs = dim // num_blocks
    hidden = dim * mlp_ratio

    key = jax.random.PRNGKey(0)
    keys = jax.random.split(key, 12)
    x = jax.random.normal(keys[0], (B, N, dim), dtype=jnp.float32)
    params = dict(
        ln1_g=1.0 + 0.02 * jax.random.normal(keys[1], (dim,), jnp.float32),
        ln1_b=0.02 * jax.random.normal(keys[2], (dim,), jnp.float32),
        ln2_g=1.0 + 0.02 * jax.random.normal(keys[3], (dim,), jnp.float32),
        ln2_b=0.02 * jax.random.normal(keys[4], (dim,), jnp.float32),
        w1=0.02 * jax.random.normal(keys[5], (2, num_blocks, bs, bs), jnp.float32),
        b1=0.02 * jax.random.normal(keys[6], (2, num_blocks, bs), jnp.float32),
        w2=0.02 * jax.random.normal(keys[7], (2, num_blocks, bs, bs), jnp.float32),
        b2=0.02 * jax.random.normal(keys[8], (2, num_blocks, bs), jnp.float32),
        fc1_w=0.02 * jax.random.normal(keys[9], (dim, hidden), jnp.float32),
        fc1_b=0.02 * jax.random.normal(keys[10], (hidden,), jnp.float32),
    )

    out = afno_block_forward(x, params, h=h, w=w, num_blocks=num_blocks,
                             softshrink=softshrink)
    out = jax.block_until_ready(out)

    ref = afno_block_reference(x, params, h=h, w=w, num_blocks=num_blocks,
                               softshrink=softshrink)
    assert out.shape == (B, N, dim)
    err = float(jnp.max(jnp.abs(out - ref)))
    # bf16 MXU operands (per perf feedback) -> expected mixed-precision drift vs the
    # f32 reference; tolerance loosened accordingly.
    assert jnp.allclose(out, ref, atol=1e-2, rtol=1e-2), err

    print("KERNEL_OK")
</pallas_src>

<mosaic_0001>
module attributes {stable_mosaic.version = 11 : i64} {
  func.func @_layernorm_kernel(%arg0: i32, %arg1: memref<128x32xf32, #tpu.memory_space<vmem>>, %arg2: memref<1x32xf32, #tpu.memory_space<vmem>>, %arg3: memref<1x32xf32, #tpu.memory_space<vmem>>, %arg4: memref<128x32xf32, #tpu.memory_space<vmem>>) attributes {dimension_semantics = [#tpu.dimension_semantics<parallel>], iteration_bounds = array<i64: 1>, scalar_prefetch = 0 : i64, scratch_operands = 0 : i64, tpu.core_type = #tpu.core_type<tc>, window_params = [{transform_indices = @transform_0, window_bounds = array<i64: 128, 32>}, {pipeline_mode = #tpu.pipeline_mode<synchronous>, transform_indices = @transform_1, window_bounds = array<i64: 1, 32>}, {pipeline_mode = #tpu.pipeline_mode<synchronous>, transform_indices = @transform_2, window_bounds = array<i64: 1, 32>}, {transform_indices = @transform_3, window_bounds = array<i64: 128, 32>}]} {
    %c0 = arith.constant 0 : index
    %c0_0 = arith.constant 0 : index
    %0 = vector.load %arg1[%c0, %c0_0] : memref<128x32xf32, #tpu.memory_space<vmem>>, vector<128x32xf32>
    %cst = arith.constant dense<0.000000e+00> : vector<128xf32>
    %1 = vector.multi_reduction <add>, %0, %cst [1] : vector<128x32xf32> to vector<128xf32>
    %2 = vector.shape_cast %1 : vector<128xf32> to vector<128x1xf32>
    %cst_1 = arith.constant 3.200000e+01 : f32
    %3 = vector.broadcast %cst_1 : f32 to vector<128x1xf32>
    %4 = arith.divf %2, %3 : vector<128x1xf32>
    %5 = vector.broadcast %4 : vector<128x1xf32> to vector<128x32xf32>
    %6 = arith.subf %0, %5 : vector<128x32xf32>
    %7 = arith.mulf %6, %6 : vector<128x32xf32>
    %cst_2 = arith.constant dense<0.000000e+00> : vector<128xf32>
    %8 = vector.multi_reduction <add>, %7, %cst_2 [1] : vector<128x32xf32> to vector<128xf32>
    %9 = vector.shape_cast %8 : vector<128xf32> to vector<128x1xf32>
    %cst_3 = arith.constant 3.200000e+01 : f32
    %10 = vector.broadcast %cst_3 : f32 to vector<128x1xf32>
    %11 = arith.divf %9, %10 : vector<128x1xf32>
    %cst_4 = arith.constant 9.99999974E-6 : f32
    %12 = vector.broadcast %cst_4 : f32 to vector<128x1xf32>
    %13 = arith.addf %11, %12 : vector<128x1xf32>
    %14 = math.rsqrt %13 : vector<128x1xf32>
    %15 = vector.broadcast %14 : vector<128x1xf32> to vector<128x32xf32>
    %16 = arith.mulf %6, %15 : vector<128x32xf32>
    %c0_5 = arith.constant 0 : index
    %c0_6 = arith.constant 0 : index
    %17 = vector.load %arg2[%c0_5, %c0_6] : memref<1x32xf32, #tpu.memory_space<vmem>>, vector<1x32xf32>
    %18 = vector.broadcast %17 : vector<1x32xf32> to vector<128x32xf32>
    %19 = arith.mulf %16, %18 : vector<128x32xf32>
    %c0_7 = arith.constant 0 : index
    %c0_8 = arith.constant 0 : index
    %20 = vector.load %arg3[%c0_7, %c0_8] : memref<1x32xf32, #tpu.memory_space<vmem>>, vector<1x32xf32>
    %21 = vector.broadcast %20 : vector<1x32xf32> to vector<128x32xf32>
    %22 = arith.addf %19, %21 : vector<128x32xf32>
    %c0_9 = arith.constant 0 : index
    %c0_10 = arith.constant 0 : index
    %23 = vector.load %arg4[%c0_9, %c0_10] : memref<128x32xf32, #tpu.memory_space<vmem>>, vector<128x32xf32>
    tpu.vector_store %arg4[%c0_9, %c0_10], %22 {strides = array<i32>} : memref<128x32xf32, #tpu.memory_space<vmem>>, vector<128x32xf32>,
    return
  }
  func.func @transform_0(%arg0: i32) -> (i32, i32) {
    %c0_i32 = arith.constant 0 : i32
    %c0_i32_0 = arith.constant 0 : i32
    return %arg0, %c0_i32 : i32, i32
  }
  func.func @transform_1(%arg0: i32) -> (i32, i32) {
    %c0_i32 = arith.constant 0 : i32
    %c0_i32_0 = arith.constant 0 : i32
    %c0_i32_1 = arith.constant 0 : i32
    return %c0_i32, %c0_i32_0 : i32, i32
  }
  func.func @transform_2(%arg0: i32) -> (i32, i32) {
    %c0_i32 = arith.constant 0 : i32
    %c0_i32_0 = arith.constant 0 : i32
    %c0_i32_1 = arith.constant 0 : i32
    return %c0_i32, %c0_i32_0 : i32, i32
  }
  func.func @transform_3(%arg0: i32) -> (i32, i32) {
    %c0_i32 = arith.constant 0 : i32
    %c0_i32_0 = arith.constant 0 : i32
    return %arg0, %c0_i32 : i32, i32
  }
}

</mosaic_0001>

<bundles_post_ra>
// kernel: tpu_custom_call.1
= control target key start
LH: loop header
LB: loop body
LE: loop exit
PB: predicated region body
PF: predicated region fallthrough
CT: control target
= control target key end

     0   :  { %vm30_vm0 = vcmask 261120   ;;  %s666_s0 = inlined_call_operand.vmem [shape: f32[128,32], index: 0, kind: input, shape index: {}]   ;;  %s667_s1 = inlined_call_operand.vmem [shape: f32[1,32], index: 1, kind: input, shape index: {}]   ;;  %s668_s2 = inlined_call_operand.vmem [shape: f32[1,32], index: 2, kind: input, shape index: {}]   ;;  %s669_s3 = inlined_call_operand.vmem [shape: f32[128,32], index: 3, kind: output, shape index: {}]  }
   0x1   :  { %v14_v0 = vld [vmem:[%s666_s0] sm:$0xff]  ;;  %v16_v1 = vld [vmem:[%s666_s0 + $0x10] sm:$0xff]  ;;  %v15_v2 = vld [vmem:[%s666_s0 + $0x8] sm:$0xff] }
   0x2   :  { %v31_v3 = vsel %vm30_vm0, %v14_v0, 0.0  ;;  %v37_v4 = vsel %vm30_vm0, %v16_v1, 0.0  ;;  %v17_v5 = vld [vmem:[%s666_s0 + $0x18] sm:$0xff]  ;;  %v34_v6 = vsel %vm30_vm0, %v15_v2, 0.0  ;;  %v18_v8 = vld [vmem:[%s666_s0 + $0x20] sm:$0xff]  ;;  %v19_v9 = vld [vmem:[%s666_s0 + $0x28] sm:$0xff] }
   0x3   :  { %32 = vadd.xlane.f32.xlu0 %v31_v3  ;;  %38 = vadd.xlane.f32.xlu1 %v37_v4  ;;  %v40_v7 = vsel %vm30_vm0, %v17_v5, 0.0  ;;  %v43_v10 = vsel %vm30_vm0, %v18_v8, 0.0  ;;  %v46_v11 = vsel %vm30_vm0, %v19_v9, 0.0  ;;  %v387_v12 = vld [vmem:[%s666_s0 + $0x30] sm:$0xff]  ;;  %v392_v13 = vld [vmem:[%s666_s0 + $0x38] sm:$0xff]  ;;  %v401_v16 = vld [vmem:[%s666_s0 + $0x40] sm:$0xff] }
   0x4   :  { %v49_v14 = vsel %vm30_vm0, %v387_v12, 0.0  ;;  %v52_v15 = vsel %vm30_vm0, %v392_v13, 0.0  ;;  %v406_v17 = vld [vmem:[%s666_s0 + $0x48] sm:$0xff]  ;;  %v55_v18 = vsel %vm30_vm0, %v401_v16, 0.0  ;;  %v415_v20 = vld [vmem:[%s666_s0 + $0x50] sm:$0xff]  ;;  %v420_v21 = vld [vmem:[%s666_s0 + $0x58] sm:$0xff] }
   0x5   :  { %v58_v19 = vsel %vm30_vm0, %v406_v17, 0.0  ;;  %v61_v22 = vsel %vm30_vm0, %v415_v20, 0.0  ;;  %v64_v23 = vsel %vm30_vm0, %v420_v21, 0.0  ;;  %v429_v24 = vld [vmem:[%s666_s0 + $0x60] sm:$0xff]  ;;  %v434_v25 = vld [vmem:[%s666_s0 + $0x68] sm:$0xff]  ;;  %v443_v28 = vld [vmem:[%s666_s0 + $0x70] sm:$0xff] }
   0x6   :  { %v67_v26 = vsel %vm30_vm0, %v429_v24, 0.0  ;;  %v70_v27 = vsel %vm30_vm0, %v434_v25, 0.0  ;;  %v448_v29 = vld [vmem:[%s666_s0 + $0x78] sm:$0xff]  ;;  %v73_v30 = vsel %vm30_vm0, %v443_v28, 0.0 }
   0x7   :  { %35 = vadd.xlane.f32.xlu0 %v34_v6  ;;  %41 = vadd.xlane.f32.xlu1 %v40_v7  ;;  %v76_v31 = vsel %vm30_vm0, %v448_v29, 0.0 }
   0xb   :  { %44 = vadd.xlane.f32.xlu0 %v43_v10  ;;  %47 = vadd.xlane.f32.xlu1 %v46_v11 }
   0xf   :  { %50 = vadd.xlane.f32.xlu0 %v49_v14  ;;  %53 = vadd.xlane.f32.xlu1 %v52_v15 }
  0x13   :  { %56 = vadd.xlane.f32.xlu0 %v55_v18  ;;  %59 = vadd.xlane.f32.xlu1 %v58_v19 }
  0x17   :  { %62 = vadd.xlane.f32.xlu0 %v61_v22  ;;  %65 = vadd.xlane.f32.xlu1 %v64_v23 }
  0x1b   :  { %68 = vadd.xlane.f32.xlu0 %v67_v26  ;;  %71 = vadd.xlane.f32.xlu1 %v70_v27 }
  0x1f   :  { %74 = vadd.xlane.f32.xlu0 %v73_v30  ;;  %77 = vadd.xlane.f32.xlu1 %v76_v31 }
  0x8c   :  { %v33_v32 = vpop.xlane.xlu0 %32  ;;  %v39_v33 = vpop.xlane.xlu1 %38 }
  0x8d   :  { %v80_v34 = vmul.f32 0.03125, %v33_v32  ;;  %v82_v35 = vmul.f32 0.03125, %v39_v33 }
  0x8f   :  { %v454_v36 = vsub.f32 %v14_v0, %v80_v34  ;;  %v456_v37 = vsub.f32 %v16_v1, %v82_v35 }
  0x90   :  { %v36_v38 = vpop.xlane.xlu0 %35  ;;  %v42_v39 = vpop.xlane.xlu1 %41 }
  0x91   :  { %v81_v40 = vmul.f32 0.03125, %v36_v38  ;;  %v83_v41 = vmul.f32 0.03125, %v42_v39  ;;  %v112_v42 = vmul.f32 %v454_v36, %v454_v36  ;;  %v114_v43 = vmul.f32 %v456_v37, %v456_v37 }
  0x93   :  { %v462_v44 = vsub.f32 %v15_v2, %v81_v40  ;;  %v464_v45 = vsub.f32 %v17_v5, %v83_v41  ;;  %v128_v46 = vsel %vm30_vm0, %v112_v42, 0.0  ;;  %v134_v49 = vsel %vm30_vm0, %v114_v43, 0.0 }
  0x94   :  { %129 = vadd.xlane.f32.xlu0 %v128_v46  ;;  %v45_v47 = vpop.xlane.xlu0 %44  ;;  %v48_v48 = vpop.xlane.xlu1 %47 }
  0x95   :  { %v84_v50 = vmul.f32 0.03125, %v45_v47  ;;  %v85_v51 = vmul.f32 0.03125, %v48_v48  ;;  %v113_v52 = vmul.f32 %v462_v44, %v462_v44  ;;  %v115_v53 = vmul.f32 %v464_v45, %v464_v45 }
  0x97   :  { %v472_v54 = vsub.f32 %v18_v8, %v84_v50  ;;  %v474_v55 = vsub.f32 %v19_v9, %v85_v51  ;;  %v131_v56 = vsel %vm30_vm0, %v113_v52, 0.0  ;;  %v137_v59 = vsel %vm30_vm0, %v115_v53, 0.0 }
  0x98   :  { %135 = vadd.xlane.f32.xlu0 %v134_v49  ;;  %132 = vadd.xlane.f32.xlu1 %v131_v56  ;;  %v51_v57 = vpop.xlane.xlu0 %50  ;;  %v54_v58 = vpop.xlane.xlu1 %53 }
  0x99   :  { %v86_v60 = vmul.f32 0.03125, %v51_v57  ;;  %v87_v61 = vmul.f32 0.03125, %v54_v58  ;;  %v116_v62 = vmul.f32 %v472_v54, %v472_v54  ;;  %v117_v63 = vmul.f32 %v474_v55, %v474_v55 }
  0x9b   :  { %v483_v0 = vsub.f32 %v387_v12, %v86_v60  ;;  %v486_v1 = vsub.f32 %v392_v13, %v87_v61  ;;  %v140_v2 = vsel %vm30_vm0, %v116_v62, 0.0  ;;  %v143_v5 = vsel %vm30_vm0, %v117_v63, 0.0 }
  0x9c   :  { %138 = vadd.xlane.f32.xlu1 %v137_v59  ;;  %141 = vadd.xlane.f32.xlu0 %v140_v2  ;;  %v57_v3 = vpop.xlane.xlu0 %56  ;;  %v60_v4 = vpop.xlane.xlu1 %59 }
  0x9d   :  { %v88_v6 = vmul.f32 0.03125, %v57_v3  ;;  %v89_v7 = vmul.f32 0.03125, %v60_v4  ;;  %v118_v8 = vmul.f32 %v483_v0, %v483_v0  ;;  %v119_v9 = vmul.f32 %v486_v1, %v486_v1 }
  0x9f   :  { %v495_v10 = vsub.f32 %v401_v16, %v88_v6  ;;  %v498_v11 = vsub.f32 %v406_v17, %v89_v7  ;;  %v146_v12 = vsel %vm30_vm0, %v118_v8, 0.0  ;;  %v149_v15 = vsel %vm30_vm0, %v119_v9, 0.0 }
  0xa0   :  { %144 = vadd.xlane.f32.xlu1 %v143_v5  ;;  %147 = vadd.xlane.f32.xlu0 %v146_v12  ;;  %v63_v13 = vpop.xlane.xlu0 %62  ;;  %v66_v14 = vpop.xlane.xlu1 %65 }
  0xa1   :  { %v90_v18 = vmul.f32 0.03125, %v63_v13  ;;  %v91_v19 = vmul.f32 0.03125, %v66_v14  ;;  %v120_v22 = vmul.f32 %v495_v10, %v495_v10  ;;  %v121_v16 = vmul.f32 %v498_v11, %v498_v11 }
  0xa3   :  { %v507_v23 = vsub.f32 %v415_v20, %v90_v18  ;;  %v510_v17 = vsub.f32 %v420_v21, %v91_v19  ;;  %v152_v26 = vsel %vm30_vm0, %v120_v22, 0.0  ;;  %v155_v31 = vsel %vm30_vm0, %v121_v16, 0.0 }
  0xa4   :  { %150 = vadd.xlane.f32.xlu1 %v149_v15  ;;  %153 = vadd.xlane.f32.xlu0 %v152_v26  ;;  %v69_v27 = vpop.xlane.xlu0 %68  ;;  %v72_v30 = vpop.xlane.xlu1 %71  ;;  %v547_v26 = vld [vmem:[%s667_s1] ss:$0 sm:$0xff] }
  0xa5   :  { %v92_v32 = vmul.f32 0.03125, %v69_v27  ;;  %v93_v33 = vmul.f32 0.03125, %v72_v30  ;;  %v122_v34 = vmul.f32 %v507_v23, %v507_v23  ;;  %v123_v20 = vmul.f32 %v510_v17, %v510_v17 }
  0xa7   :  { %v519_v35 = vsub.f32 %v429_v24, %v92_v32  ;;  %v522_v21 = vsub.f32 %v434_v25, %v93_v33  ;;  %v158_v38 = vsel %vm30_vm0, %v122_v34, 0.0  ;;  %v161_v41 = vsel %vm30_vm0, %v123_v20, 0.0  ;;  %v553_v32 = vld [vmem:[%s668_s2] ss:$0 sm:$0xff] }
  0xa8   :  { %156 = vadd.xlane.f32.xlu1 %v155_v31  ;;  %159 = vadd.xlane.f32.xlu0 %v158_v38  ;;  %v75_v39 = vpop.xlane.xlu0 %74  ;;  %v78_v40 = vpop.xlane.xlu1 %77 }
  0xa9   :  { %v94_v42 = vmul.f32 0.03125, %v75_v39  ;;  %v95_v43 = vmul.f32 0.03125, %v78_v40  ;;  %v124_v46 = vmul.f32 %v519_v35, %v519_v35  ;;  %v125_v24 = vmul.f32 %v522_v21, %v522_v21 }
  0xab   :  { %v531_v47 = vsub.f32 %v443_v28, %v94_v42  ;;  %v534_v25 = vsub.f32 %v448_v29, %v95_v43  ;;  %v164_v48 = vsel %vm30_vm0, %v124_v46, 0.0  ;;  %v167_v49 = vsel %vm30_vm0, %v125_v24, 0.0 }
  0xac   :  { %162 = vadd.xlane.f32.xlu1 %v161_v41  ;;  %165 = vadd.xlane.f32.xlu0 %v164_v48 }
  0xad   :  { %v126_v50 = vmul.f32 %v531_v47, %v531_v47  ;;  %v127_v51 = vmul.f32 %v534_v25, %v534_v25 }
  0xaf   :  { %v170_v52 = vsel %vm30_vm0, %v126_v50, 0.0  ;;  %v173_v28 = vsel %vm30_vm0, %v127_v51, 0.0 }
  0xb0   :  { %168 = vadd.xlane.f32.xlu1 %v167_v49  ;;  %171 = vadd.xlane.f32.xlu0 %v170_v52 }
  0xb4   :  { %174 = vadd.xlane.f32.xlu1 %v173_v28 }
 0x11d   :  { %v130_v29 = vpop.xlane.xlu0 %129 }
 0x11e   :  { %v176_v53 = vmul.f32 0.03125, %v130_v29 }
 0x120   :  { %v192_v56 = vadd.f32 1e-05, %v176_v53 }
 0x121   :  { %v133_v57 = vpop.xlane.xlu1 %132  ;;  %v136_v58 = vpop.xlane.xlu0 %135 }
 0x122   :  { %308 = vrsqrt.f32 %v192_v56  ;;  %v177_v59 = vmul.f32 0.03125, %v133_v57  ;;  %v178_v60 = vmul.f32 0.03125, %v136_v58 }
 0x124   :  { %v193_v61 = vadd.f32 1e-05, %v177_v59  ;;  %v194_v62 = vadd.f32 1e-05, %v178_v60 }
 0x125   :  { %v139_v63 = vpop.xlane.xlu1 %138  ;;  %v142_v2 = vpop.xlane.xlu0 %141 }
 0x126   :  { %310 = vrsqrt.f32 %v193_v61  ;;  %v179_v3 = vmul.f32 0.03125, %v139_v63  ;;  %v180_v4 = vmul.f32 0.03125, %v142_v2 }
 0x127   :  { %312 = vrsqrt.f32 %v194_v62 }
 0x128   :  { %v195_v5 = vadd.f32 1e-05, %v179_v3  ;;  %v196_v6 = vadd.f32 1e-05, %v180_v4 }
 0x129   :  { %v145_v7 = vpop.xlane.xlu1 %144  ;;  %v148_v8 = vpop.xlane.xlu0 %147 }
 0x12a   :  { %314 = vrsqrt.f32 %v195_v5  ;;  %v181_v9 = vmul.f32 0.03125, %v145_v7  ;;  %v182_v12 = vmul.f32 0.03125, %v148_v8 }
 0x12b   :  { %316 = vrsqrt.f32 %v196_v6 }
 0x12c   :  { %v197_v13 = vadd.f32 1e-05, %v181_v9  ;;  %v198_v14 = vadd.f32 1e-05, %v182_v12 }
 0x12d   :  { %v151_v15 = vpop.xlane.xlu1 %150  ;;  %v154_v18 = vpop.xlane.xlu0 %153 }
 0x12e   :  { %318 = vrsqrt.f32 %v197_v13  ;;  %v183_v19 = vmul.f32 0.03125, %v151_v15  ;;  %v184_v22 = vmul.f32 0.03125, %v154_v18 }
 0x12f   :  { %v309_v16 = vpop.eup %308  ;;  %320 = vrsqrt.f32 %v198_v14 }
 0x130   :  { %v224_v27 = vmul.f32 %v309_v16, %v454_v36  ;;  %v199_v30 = vadd.f32 1e-05, %v183_v19  ;;  %v200_v31 = vadd.f32 1e-05, %v184_v22 }
 0x131   :  { %v157_v33 = vpop.xlane.xlu1 %156  ;;  %v160_v34 = vpop.xlane.xlu0 %159 }
 0x132   :  { %v247_v20 = vmul.f32 %v547_v26, %v224_v27  ;;  %322 = vrsqrt.f32 %v199_v30  ;;  %v185_v38 = vmul.f32 0.03125, %v157_v33  ;;  %v186_v39 = vmul.f32 0.03125, %v160_v34 }
 0x133   :  { %v311_v40 = vpop.eup %310  ;;  %324 = vrsqrt.f32 %v200_v31 }
 0x134   :  { %v313_v41 = vpop.eup %312  ;;  %v270_v42 = vadd.f32 %v553_v32, %v247_v20  ;;  %v225_v36 = vmul.f32 %v311_v40, %v462_v44  ;;  %v201_v43 = vadd.f32 1e-05, %v185_v38  ;;  %v202_v46 = vadd.f32 1e-05, %v186_v39 }
 0x135   :  { %v226_v24 = vmul.f32 %v313_v41, %v456_v37  ;;  %v163_v48 = vpop.xlane.xlu1 %162  ;;  %v166_v49 = vpop.xlane.xlu0 %165 }
 0x136   :  { %286 = vst.msk [vmem:[%s669_s3] sm:$0xff] %vm30_vm0, %v270_v42  ;;  %v248_v50 = vmul.f32 %v547_v26, %v225_v36  ;;  %326 = vrsqrt.f32 %v201_v43  ;;  %v187_v51 = vmul.f32 0.03125, %v163_v48  ;;  %v188_v52 = vmul.f32 0.03125, %v166_v49 }
 0x137   :  { %v315_v28 = vpop.eup %314  ;;  %v249_v29 = vmul.f32 %v547_v26, %v226_v24  ;;  %328 = vrsqrt.f32 %v202_v46 }
 0x138   :  { %v317_v44 = vpop.eup %316  ;;  %v271_v53 = vadd.f32 %v553_v32, %v248_v50  ;;  %v227_v37 = vmul.f32 %v315_v28, %v464_v45  ;;  %v203_v56 = vadd.f32 1e-05, %v187_v51  ;;  %v204_v57 = vadd.f32 1e-05, %v188_v52 }
 0x139   :  { %v272_v58 = vadd.f32 %v553_v32, %v249_v29  ;;  %v228_v59 = vmul.f32 %v317_v44, %v472_v54  ;;  %v169_v60 = vpop.xlane.xlu1 %168  ;;  %v172_v61 = vpop.xlane.xlu0 %171 }
 0x13a   :  { %287 = vst.msk [vmem:[%s669_s3 + $0x8] sm:$0xff] %vm30_vm0, %v271_v53  ;;  %v250_v62 = vmul.f32 %v547_v26, %v227_v37  ;;  %330 = vrsqrt.f32 %v203_v56  ;;  %v189_v63 = vmul.f32 0.03125, %v169_v60  ;;  %v190_v2 = vmul.f32 0.03125, %v172_v61 }
 0x13b   :  { %v319_v3 = vpop.eup %318  ;;  %288 = vst.msk [vmem:[%s669_s3 + $0x10] sm:$0xff] %vm30_vm0, %v272_v58  ;;  %v251_v45 = vmul.f32 %v547_v26, %v228_v59  ;;  %332 = vrsqrt.f32 %v204_v57 }
 0x13c   :  { %v321_v54 = vpop.eup %320  ;;  %v273_v4 = vadd.f32 %v553_v32, %v250_v62  ;;  %v229_v5 = vmul.f32 %v319_v3, %v474_v55  ;;  %v205_v6 = vadd.f32 1e-05, %v189_v63  ;;  %v206_v7 = vadd.f32 1e-05, %v190_v2 }
 0x13d   :  { %v274_v8 = vadd.f32 %v553_v32, %v251_v45  ;;  %v230_v9 = vmul.f32 %v321_v54, %v483_v0  ;;  %v175_v12 = vpop.xlane.xlu1 %174 }
 0x13e   :  { %289 = vst.msk [vmem:[%s669_s3 + $0x18] sm:$0xff] %vm30_vm0, %v273_v4  ;;  %v252_v13 = vmul.f32 %v547_v26, %v229_v5  ;;  %334 = vrsqrt.f32 %v205_v6  ;;  %v191_v14 = vmul.f32 0.03125, %v175_v12 }
 0x13f   :  { %v323_v15 = vpop.eup %322  ;;  %290 = vst.msk [vmem:[%s669_s3 + $0x20] sm:$0xff] %vm30_vm0, %v274_v8  ;;  %v253_v55 = vmul.f32 %v547_v26, %v230_v9  ;;  %336 = vrsqrt.f32 %v206_v7 }
 0x140   :  { %v325_v0 = vpop.eup %324  ;;  %v275_v18 = vadd.f32 %v553_v32, %v252_v13  ;;  %v231_v19 = vmul.f32 %v323_v15, %v486_v1  ;;  %v207_v22 = vadd.f32 1e-05, %v191_v14 }
 0x141   :  { %v276_v16 = vadd.f32 %v553_v32, %v253_v55  ;;  %v232_v27 = vmul.f32 %v325_v0, %v495_v10 }
 0x142   :  { %291 = vst.msk [vmem:[%s669_s3 + $0x28] sm:$0xff] %vm30_vm0, %v275_v18  ;;  %v254_v30 = vmul.f32 %v547_v26, %v231_v19  ;;  %338 = vrsqrt.f32 %v207_v22 }
 0x143   :  { %v327_v31 = vpop.eup %326  ;;  %292 = vst.msk [vmem:[%s669_s3 + $0x30] sm:$0xff] %vm30_vm0, %v276_v16  ;;  %v255_v1 = vmul.f32 %v547_v26, %v232_v27 }
 0x144   :  { %v329_v33 = vpop.eup %328  ;;  %v277_v34 = vadd.f32 %v553_v32, %v254_v30  ;;  %v233_v10 = vmul.f32 %v327_v31, %v498_v11 }
 0x145   :  { %v278_v20 = vadd.f32 %v553_v32, %v255_v1  ;;  %v234_v38 = vmul.f32 %v329_v33, %v507_v23 }
 0x146   :  { %293 = vst.msk [vmem:[%s669_s3 + $0x38] sm:$0xff] %vm30_vm0, %v277_v34  ;;  %v256_v39 = vmul.f32 %v547_v26, %v233_v10 }
 0x147   :  { %v331_v40 = vpop.eup %330  ;;  %294 = vst.msk [vmem:[%s669_s3 + $0x40] sm:$0xff] %vm30_vm0, %v278_v20  ;;  %v257_v41 = vmul.f32 %v547_v26, %v234_v38 }
 0x148   :  { %v333_v11 = vpop.eup %332  ;;  %v279_v42 = vadd.f32 %v553_v32, %v256_v39  ;;  %v235_v23 = vmul.f32 %v331_v40, %v510_v17 }
 0x149   :  { %v280_v36 = vadd.f32 %v553_v32, %v257_v41  ;;  %v236_v43 = vmul.f32 %v333_v11, %v519_v35 }
 0x14a   :  { %295 = vst.msk [vmem:[%s669_s3 + $0x48] sm:$0xff] %vm30_vm0, %v279_v42  ;;  %v258_v46 = vmul.f32 %v547_v26, %v235_v23 }
 0x14b   :  { %v335_v24 = vpop.eup %334  ;;  %296 = vst.msk [vmem:[%s669_s3 + $0x50] sm:$0xff] %vm30_vm0, %v280_v36  ;;  %v259_v48 = vmul.f32 %v547_v26, %v236_v43 }
 0x14c   :  { %v337_v17 = vpop.eup %336  ;;  %v281_v49 = vadd.f32 %v553_v32, %v258_v46  ;;  %v237_v35 = vmul.f32 %v335_v24, %v522_v21 }
 0x14d   :  { %v282_v50 = vadd.f32 %v553_v32, %v259_v48  ;;  %v238_v51 = vmul.f32 %v337_v17, %v531_v47 }
 0x14e   :  { %297 = vst.msk [vmem:[%s669_s3 + $0x58] sm:$0xff] %vm30_vm0, %v281_v49  ;;  %v260_v52 = vmul.f32 %v547_v26, %v237_v35 }
 0x14f   :  { %v339_v28 = vpop.eup %338  ;;  %298 = vst.msk [vmem:[%s669_s3 + $0x60] sm:$0xff] %vm30_vm0, %v282_v50  ;;  %v261_v29 = vmul.f32 %v547_v26, %v238_v51 }
 0x150   :  { %v283_v21 = vadd.f32 %v553_v32, %v260_v52  ;;  %v239_v44 = vmul.f32 %v339_v28, %v534_v25 }
 0x151   :  { %v284_v47 = vadd.f32 %v553_v32, %v261_v29 }
 0x152   :  { %299 = vst.msk [vmem:[%s669_s3 + $0x68] sm:$0xff] %vm30_vm0, %v283_v21  ;;  %v262_v53 = vmul.f32 %v547_v26, %v239_v44 }
 0x153   :  { %300 = vst.msk [vmem:[%s669_s3 + $0x70] sm:$0xff] %vm30_vm0, %v284_v47 }
 0x154   :  { %v285_v37 = vadd.f32 %v553_v32, %v262_v53 }
 0x156   :  { %301 = vst.msk [vmem:[%s669_s3 + $0x78] sm:$0xff] %vm30_vm0, %v285_v37 }

</bundles_post_ra>
